<compile_context>
chip_gen: v5e
topology: v5e:2x2
jax: 0.10.0
libtpu: 0.0.40
codegen_flags: <defaults>
</compile_context>

<pallas_src>
import functools

import jax
import jax.numpy as jnp
from jax import lax
from jax.experimental import pallas as pl
from jax.experimental.pallas import tpu as pltpu


# ----------------------------- in-kernel helpers -----------------------------

def _mlp_head(max_out, avg_out, w1m, w1a, b1, w2, b2):
    # cat([max, avg], dim=1) @ W1  ==  max @ W1[:C] + avg @ W1[C:]
    h = (jnp.dot(max_out, w1m, preferred_element_type=jnp.float32)
         + jnp.dot(avg_out, w1a, preferred_element_type=jnp.float32)
         + b1)
    h = jnp.maximum(h, 0.0)
    y = jnp.dot(h, w2, preferred_element_type=jnp.float32) + b2
    return jnp.maximum(jnp.tanh(y), 0.0)          # activateFunc = relu(tanh(.))


def _fold_block(x_ref, sum_sc, max_sc, *, tile_hw, masked, start_off, hw):
    """Fold the resident (B, C, tile_hw) block into the (B, C, 128) accumulators.

    The 128-lane slices are combined in vregs (Python-unrolled static slices,
    free views), so the scratch read-modify-write happens exactly once per step.
    """
    n_sub = tile_hw // 128
    if masked:
        lane = lax.broadcasted_iota(
            jnp.int32, (x_ref.shape[0], x_ref.shape[1], 128), 2)
        base = lane + start_off
    acc_s = None
    acc_m = None
    for j in range(n_sub):
        xj = x_ref[:, :, pl.ds(j * 128, 128)]
        if masked:
            valid = (base + (j * 128)) < hw
            xs = jnp.where(valid, xj, 0.0)
            xm = jnp.where(valid, xj, -jnp.inf)
        else:
            xs = xj
            xm = xj
        acc_s = xs if acc_s is None else acc_s + xs
        acc_m = xm if acc_m is None else jnp.maximum(acc_m, xm)
    sum_sc[...] = sum_sc[...] + acc_s
    max_sc[...] = jnp.maximum(max_sc[...], acc_m)


# --------------------------------- kernels -----------------------------------

def _router_single_kernel(x_ref, w1m_ref, w1a_ref, b1_ref, w2_ref, b2_ref,
                          o_ref, *, hw):
    """Whole H*W fits one block: reduce directly, no scratch / phase gating."""
    x = x_ref[...]                                       # (B, C, hw)
    avg_out = jnp.sum(x, axis=-1) * (1.0 / hw)           # (B, C)
    max_out = jnp.max(x, axis=-1)                        # (B, C)
    o_ref[...] = _mlp_head(max_out, avg_out, w1m_ref[...], w1a_ref[...],
                           b1_ref[...], w2_ref[...], b2_ref[...])


def _router_tiled_kernel(x_ref, w1m_ref, w1a_ref, b1_ref, w2_ref, b2_ref,
                         o_ref, sum_sc, max_sc, *, hw, tile_hw):
    """Streaming reduction over H*W (single split); tiny MLP in the epilogue."""
    k = pl.program_id(0)
    last = pl.num_programs(0) - 1

    @pl.when(k == 0)
    def _init():
        sum_sc[...] = jnp.zeros_like(sum_sc)
        max_sc[...] = jnp.full_like(max_sc, -jnp.inf)

    start_off = k * tile_hw
    if hw % tile_hw != 0:
        # Only the final block overhangs H*W (its tail is stale VMEM) -> mask it;
        # every earlier step takes the unmasked fast path.
        @pl.when(k == last)
        def _fold_masked():
            _fold_block(x_ref, sum_sc, max_sc, tile_hw=tile_hw, masked=True,
                        start_off=start_off, hw=hw)

        @pl.when(k != last)
        def _fold_fast():
            _fold_block(x_ref, sum_sc, max_sc, tile_hw=tile_hw, masked=False,
                        start_off=start_off, hw=hw)
    else:
        _fold_block(x_ref, sum_sc, max_sc, tile_hw=tile_hw, masked=False,
                    start_off=start_off, hw=hw)

    @pl.when(k == last)
    def _epilogue():
        avg_out = jnp.sum(sum_sc[...], axis=-1) * (1.0 / hw)    # (B, C)
        max_out = jnp.max(max_sc[...], axis=-1)                 # (B, C)
        o_ref[...] = _mlp_head(max_out, avg_out, w1m_ref[...], w1a_ref[...],
                               b1_ref[...], w2_ref[...], b2_ref[...])


def _router_pool_split_kernel(x_ref, psum_ref, pmax_ref, sum_sc, max_sc, *,
                              hw, tile_hw, may_mask):
    """Split pooling: leading 'parallel' axis shards the H*W range (both v7x
    TensorCores); each split writes partial (sum, max) pooled stats."""
    s = pl.program_id(0)
    k = pl.program_id(1)
    steps = pl.num_programs(1)

    @pl.when(k == 0)
    def _init():
        sum_sc[...] = jnp.zeros_like(sum_sc)
        max_sc[...] = jnp.full_like(max_sc, -jnp.inf)

    g_step = s * steps + k                 # global (unclamped) block index
    start_off = g_step * tile_hw
    if may_mask:
        overhang = (start_off + tile_hw) > hw

        @pl.when(overhang)
        def _fold_masked():
            _fold_block(x_ref, sum_sc, max_sc, tile_hw=tile_hw, masked=True,
                        start_off=start_off, hw=hw)

        @pl.when(jnp.logical_not(overhang))
        def _fold_fast():
            _fold_block(x_ref, sum_sc, max_sc, tile_hw=tile_hw, masked=False,
                        start_off=start_off, hw=hw)
    else:
        _fold_block(x_ref, sum_sc, max_sc, tile_hw=tile_hw, masked=False,
                    start_off=start_off, hw=hw)

    @pl.when(k == steps - 1)
    def _write():
        psum_ref[...] = jnp.sum(sum_sc[...], axis=-1)[None]     # (1, B, C)
        pmax_ref[...] = jnp.max(max_sc[...], axis=-1)[None]     # (1, B, C)


# ------------------------------ sizing helpers --------------------------------

def _vmem_capacity_bytes():
    try:
        cap = int(pltpu.get_tpu_info().vmem_capacity_bytes)
        if cap > 0:
            return cap
    except Exception:
        pass
    return 64 << 20            # conservative: v7x per-TensorCore VMEM


def _num_tensorcores():
    try:
        info = pltpu.get_tpu_info()
        for name in ("num_cores", "core_count", "num_tensorcores",
                     "tensorcores_per_chip", "cores_per_chip"):
            v = getattr(info, name, None)
            if v is not None and int(v) > 0:
                return int(v)
    except Exception:
        pass
    return 1


def _pick_tile_hw(B, C, hw, budget_bytes):
    """Largest 128-multiple lane tile whose double-buffered x block (plus the
    fixed 128-lane accumulators) fits the generation-aware VMEM budget."""
    hw_pad = -(-hw // 128) * 128
    fixed = 2 * B * C * 128 * 4             # narrow sum/max accumulators
    per_lane = 2 * B * C * 4                # double-buffered f32 x block
    avail = max(budget_bytes - fixed, 128 * per_lane)
    max_lanes = max(128, (avail // per_lane) // 128 * 128)
    return int(min(hw_pad, max_lanes, 16384))


def _vmem_limit_bytes(need_bytes, cap_bytes):
    lo = 16 << 20
    hi = max(lo, int(cap_bytes * 0.55))
    return int(min(max(int(need_bytes * 1.5), lo), hi))


# --------------------------------- wrapper ------------------------------------

def router_forward(x_nchw, w1, b1, w2, b2, *, tile_hw=None, hw_splits=None):
    """x_nchw: (B, C, H, W) f32; w1: (2C, C); w2: (C, P). Returns (B, P) f32."""
    B, C, H, W = x_nchw.shape
    hw = H * W
    P = w2.shape[1]

    cap = _vmem_capacity_bytes()
    budget = int(cap * 0.40)

    if tile_hw is None:
        tile_hw = _pick_tile_hw(B, C, hw, budget)
    tile_hw = max(128, (int(tile_hw) // 128) * 128)
    n_steps = pl.cdiv(hw, tile_hw)

    x_flat = x_nchw.reshape(B, C, hw)
    # Split W1 so the kernel never concatenates along lanes.
    w1m = w1[:C]
    w1a = w1[C:]
    b1_2d = b1.reshape(1, C)
    b2_2d = b2.reshape(1, P)

    weight_bytes = 4 * (2 * C * C + C + C * P + P + B * P)
    weight_specs = [
        pl.BlockSpec((C, C), lambda k: (0, 0)),     # W1[:C]   (max branch)
        pl.BlockSpec((C, C), lambda k: (0, 0)),     # W1[C:]   (avg branch)
        pl.BlockSpec((1, C), lambda k: (0, 0)),     # b1
        pl.BlockSpec((C, P), lambda k: (0, 0)),     # W2
        pl.BlockSpec((1, P), lambda k: (0, 0)),     # b2
    ]

    # ---- Path A: whole H*W fits a single block --------------------------------
    if n_steps == 1:
        vmem_need = 2 * B * C * hw * 4 + 2 * weight_bytes + 2 * B * P * 4
        return pl.pallas_call(
            functools.partial(_router_single_kernel, hw=hw),
            out_shape=jax.ShapeDtypeStruct((B, P), jnp.float32),
            grid_spec=pltpu.PrefetchScalarGridSpec(
                num_scalar_prefetch=0,
                grid=(1,),
                in_specs=[pl.BlockSpec((B, C, hw), lambda k: (0, 0, 0))]
                         + weight_specs,
                out_specs=pl.BlockSpec((B, P), lambda k: (0, 0)),
            ),
            compiler_params=pltpu.CompilerParams(
                dimension_semantics=("arbitrary",),
                vmem_limit_bytes=_vmem_limit_bytes(vmem_need, cap)),
            cost_estimate=pl.CostEstimate(
                flops=2 * B * C * hw + 2 * B * (2 * C) * C + 2 * B * C * P,
                transcendentals=B * P,
                bytes_accessed=4 * B * C * hw + weight_bytes + 4 * B * P),
        )(x_flat, w1m, w1a, b1_2d, w2, b2_2d)

    if hw_splits is None:
        # TODO(synk): pltpu.get_tpu_info() may not expose the TensorCore count;
        # pass hw_splits=2 explicitly on v7x to shard the HBM read over both TCs.
        hw_splits = _num_tensorcores() if n_steps >= 8 else 1
    hw_splits = int(max(1, min(hw_splits, n_steps)))

    # ---- Path B: tiled streaming reduction, single split, MLP in epilogue -----
    if hw_splits == 1:
        vmem_need = (2 * B * C * tile_hw * 4 + 2 * B * C * 128 * 4
                     + 2 * weight_bytes + 2 * B * P * 4)
        return pl.pallas_call(
            functools.partial(_router_tiled_kernel, hw=hw, tile_hw=tile_hw),
            out_shape=jax.ShapeDtypeStruct((B, P), jnp.float32),
            grid_spec=pltpu.PrefetchScalarGridSpec(
                num_scalar_prefetch=0,
                grid=(n_steps,),
                in_specs=[pl.BlockSpec((B, C, tile_hw), lambda k: (0, 0, k))]
                         + weight_specs,
                out_specs=pl.BlockSpec((B, P), lambda k: (0, 0)),
                scratch_shapes=[pltpu.VMEM((B, C, 128), jnp.float32),   # run. sum
                                pltpu.VMEM((B, C, 128), jnp.float32)],  # run. max
            ),
            compiler_params=pltpu.CompilerParams(
                dimension_semantics=("arbitrary",),
                vmem_limit_bytes=_vmem_limit_bytes(vmem_need, cap)),
            cost_estimate=pl.CostEstimate(
                flops=2 * B * C * hw + 2 * B * (2 * C) * C + 2 * B * C * P,
                transcendentals=B * P,
                bytes_accessed=4 * B * C * hw + weight_bytes + 4 * B * P),
        )(x_flat, w1m, w1a, b1_2d, w2, b2_2d)

    # ---- Path C: split pooling on a 'parallel' axis (both v7x TensorCores) ----
    steps_per_split = pl.cdiv(n_steps, hw_splits)
    padded_steps = hw_splits * steps_per_split
    may_mask = (padded_steps != n_steps) or (hw % tile_hw != 0)

    if padded_steps != n_steps:
        # Trailing grid steps of the last split fall entirely past H*W: clamp
        # their DMA to the last real block (the kernel fully masks them).
        def x_index(s, k):
            return (0, 0, jnp.minimum(s * steps_per_split + k, n_steps - 1))
    else:
        def x_index(s, k):
            return (0, 0, s * steps_per_split + k)

    vmem_need = (2 * B * C * tile_hw * 4 + 2 * B * C * 128 * 4
                 + 4 * 4 * hw_splits * B * C)
    psum, pmax = pl.pallas_call(
        functools.partial(_router_pool_split_kernel, hw=hw, tile_hw=tile_hw,
                          may_mask=may_mask),
        out_shape=(jax.ShapeDtypeStruct((hw_splits, B, C), jnp.float32),
                   jax.ShapeDtypeStruct((hw_splits, B, C), jnp.float32)),
        grid_spec=pltpu.PrefetchScalarGridSpec(
            num_scalar_prefetch=0,
            grid=(hw_splits, steps_per_split),
            in_specs=[pl.BlockSpec((B, C, tile_hw), x_index)],
            out_specs=[pl.BlockSpec((1, B, C), lambda s, k: (s, 0, 0)),
                       pl.BlockSpec((1, B, C), lambda s, k: (s, 0, 0))],
            scratch_shapes=[pltpu.VMEM((B, C, 128), jnp.float32),
                            pltpu.VMEM((B, C, 128), jnp.float32)],
        ),
        compiler_params=pltpu.CompilerParams(
            dimension_semantics=("parallel", "arbitrary"),
            vmem_limit_bytes=_vmem_limit_bytes(vmem_need, cap)),
        cost_estimate=pl.CostEstimate(
            flops=2 * B * C * hw,
            transcendentals=0,
            bytes_accessed=4 * (B * C * hw + 2 * hw_splits * B * C)),
    )(x_flat)

    # Cross-split combine + tiny MLP head (microscopic next to the pooling).
    avg_out = jnp.sum(psum, axis=0) * (1.0 / hw)
    max_out = jnp.max(pmax, axis=0)
    h = jnp.maximum(max_out @ w1m + avg_out @ w1a + b1_2d, 0.0)
    y = h @ w2 + b2_2d
    return jnp.maximum(jnp.tanh(y), 0.0)


# ------------------------------ params & reference ----------------------------

def init_router_params(key, embed_size, num_out_path):
    """Deterministic synthetic init (PyTorch Linear-like scale; b2 filled 1.5)."""
    k1, k2 = jax.random.split(key)
    lim1 = 1.0 / jnp.sqrt(2.0 * embed_size)
    lim2 = 1.0 / jnp.sqrt(float(embed_size))
    # Stored as (in, out) so the kernel does x @ W (== x @ W_torch.T).
    w1 = jax.random.uniform(k1, (2 * embed_size, embed_size), jnp.float32, -lim1, lim1)
    b1 = jnp.zeros((embed_size,), jnp.float32)
    w2 = jax.random.uniform(k2, (embed_size, num_out_path), jnp.float32, -lim2, lim2)
    b2 = jnp.full((num_out_path,), 1.5, jnp.float32)   # init_weights(): bias.fill_(1.5)
    return w1, b1, w2, b2


def _router_ref(x_nchw, w1, b1, w2, b2):
    avg_out = jnp.mean(x_nchw, axis=(2, 3))
    max_out = jnp.max(x_nchw, axis=(2, 3))
    f = jnp.concatenate([max_out, avg_out], axis=1)
    h = jnp.maximum(f @ w1 + b1, 0.0)
    y = h @ w2 + b2
    return jnp.maximum(jnp.tanh(y), 0.0)


if __name__ == "__main__":
    key = jax.random.PRNGKey(0)
    kp, k1, k2, k3, k4, k5 = jax.random.split(key, 6)

    B, C = 2, 32                     # embed_size = C = 32
    num_out_path = 4
    w1, b1, w2, b2 = init_router_params(kp, C, num_out_path)

    def check(x, name, **kw):
        out = jax.block_until_ready(router_forward(x, w1, b1, w2, b2, **kw))
        ref = _router_ref(x, w1, b1, w2, b2)
        assert out.shape == ref.shape, f"shape mismatch: {name}"
        assert jnp.allclose(out, ref, atol=1e-5, rtol=1e-5), f"mismatch: {name}"

    # 1) Multi-step pipelined reduction (path B), exact 128-lane tiles.
    check(jax.random.normal(k1, (B, C, 16, 16), jnp.float32), "tiled", tile_hw=128)
    # 2) Single-block fast path (path A), H*W = 81 not a multiple of 128.
    check(jax.random.normal(k2, (B, C, 9, 9), jnp.float32), "single-block")
    # 3) Multi-step with a partial last tile -> gated masking (path B).
    check(jax.random.normal(k3, (B, C, 15, 15), jnp.float32), "masked-tail",
          tile_hw=128)
    # 4) Split pooling on the parallel axis (path C), partial last tile.
    check(jax.random.normal(k4, (B, C, 20, 20), jnp.float32), "split",
          tile_hw=128, hw_splits=2)
    # 5) Split pooling where padding creates fully out-of-range steps (clamp).
    check(jax.random.normal(k5, (B, C, 24, 16), jnp.float32), "split-ragged",
          tile_hw=128, hw_splits=2)

    print("KERNEL_OK")
</pallas_src>

<mosaic_0001>
module attributes {stable_mosaic.version = 11 : i64} {
  func.func @_router_tiled_kernel(%arg0: i32, %arg1: memref<2x32x128xf32, #tpu.memory_space<vmem>>, %arg2: memref<32x32xf32, #tpu.memory_space<vmem>>, %arg3: memref<32x32xf32, #tpu.memory_space<vmem>>, %arg4: memref<1x32xf32, #tpu.memory_space<vmem>>, %arg5: memref<32x4xf32, #tpu.memory_space<vmem>>, %arg6: memref<1x4xf32, #tpu.memory_space<vmem>>, %arg7: memref<2x4xf32, #tpu.memory_space<vmem>>, %arg8: memref<2x32x128xf32, #tpu.memory_space<vmem>>, %arg9: memref<2x32x128xf32, #tpu.memory_space<vmem>>) attributes {dimension_semantics = [#tpu.dimension_semantics<arbitrary>], iteration_bounds = array<i64: 2>, scalar_prefetch = 0 : i64, scratch_operands = 2 : i64, tpu.core_type = #tpu.core_type<tc>, window_params = [{transform_indices = @transform_0, window_bounds = array<i64: 2, 32, 128>}, {pipeline_mode = #tpu.pipeline_mode<synchronous>, transform_indices = @transform_1, window_bounds = array<i64: 32, 32>}, {pipeline_mode = #tpu.pipeline_mode<synchronous>, transform_indices = @transform_2, window_bounds = array<i64: 32, 32>}, {pipeline_mode = #tpu.pipeline_mode<synchronous>, transform_indices = @transform_3, window_bounds = array<i64: 1, 32>}, {pipeline_mode = #tpu.pipeline_mode<synchronous>, transform_indices = @transform_4, window_bounds = array<i64: 32, 4>}, {pipeline_mode = #tpu.pipeline_mode<synchronous>, transform_indices = @transform_5, window_bounds = array<i64: 1, 4>}, {pipeline_mode = #tpu.pipeline_mode<synchronous>, transform_indices = @transform_6, window_bounds = array<i64: 2, 4>}]} {
    %c0_i32 = arith.constant 0 : i32
    %0 = arith.cmpi eq, %arg0, %c0_i32 : i32
    %1 = arith.extui %0 : i1 to i32
    %c0_i32_0 = arith.constant 0 : i32
    %2 = arith.cmpi ne, %1, %c0_i32_0 : i32
    scf.if %2 {
      %cst = arith.constant 0.000000e+00 : f32
      %13 = vector.broadcast %cst : f32 to vector<2x32x128xf32>
      %c0_16 = arith.constant 0 : index
      %c0_17 = arith.constant 0 : index
      %c0_18 = arith.constant 0 : index
      %14 = vector.load %arg8[%c0_16, %c0_17, %c0_18] : memref<2x32x128xf32, #tpu.memory_space<vmem>>, vector<2x32x128xf32>
      tpu.vector_store %arg8[%c0_16, %c0_17, %c0_18], %13 {strides = array<i32>} : memref<2x32x128xf32, #tpu.memory_space<vmem>>, vector<2x32x128xf32>,
      %cst_19 = arith.constant 0xFF800000 : f32
      %15 = vector.broadcast %cst_19 : f32 to vector<2x32x128xf32>
      %c0_20 = arith.constant 0 : index
      %c0_21 = arith.constant 0 : index
      %c0_22 = arith.constant 0 : index
      %16 = vector.load %arg9[%c0_20, %c0_21, %c0_22] : memref<2x32x128xf32, #tpu.memory_space<vmem>>, vector<2x32x128xf32>
      tpu.vector_store %arg9[%c0_20, %c0_21, %c0_22], %15 {strides = array<i32>} : memref<2x32x128xf32, #tpu.memory_space<vmem>>, vector<2x32x128xf32>,
    } else {
    }
    %c0 = arith.constant 0 : index
    %c0_1 = arith.constant 0 : index
    %c0_2 = arith.constant 0 : index
    %3 = vector.load %arg1[%c0, %c0_1, %c0_2] : memref<2x32x128xf32, #tpu.memory_space<vmem>>, vector<2x32x128xf32>
    %c0_3 = arith.constant 0 : index
    %c0_4 = arith.constant 0 : index
    %c0_5 = arith.constant 0 : index
    %4 = vector.load %arg8[%c0_3, %c0_4, %c0_5] : memref<2x32x128xf32, #tpu.memory_space<vmem>>, vector<2x32x128xf32>
    %5 = arith.addf %4, %3 : vector<2x32x128xf32>
    %c0_6 = arith.constant 0 : index
    %c0_7 = arith.constant 0 : index
    %c0_8 = arith.constant 0 : index
    %6 = vector.load %arg8[%c0_6, %c0_7, %c0_8] : memref<2x32x128xf32, #tpu.memory_space<vmem>>, vector<2x32x128xf32>
    tpu.vector_store %arg8[%c0_6, %c0_7, %c0_8], %5 {strides = array<i32>} : memref<2x32x128xf32, #tpu.memory_space<vmem>>, vector<2x32x128xf32>,
    %c0_9 = arith.constant 0 : index
    %c0_10 = arith.constant 0 : index
    %c0_11 = arith.constant 0 : index
    %7 = vector.load %arg9[%c0_9, %c0_10, %c0_11] : memref<2x32x128xf32, #tpu.memory_space<vmem>>, vector<2x32x128xf32>
    %8 = arith.maximumf %7, %3 : vector<2x32x128xf32>
    %c0_12 = arith.constant 0 : index
    %c0_13 = arith.constant 0 : index
    %c0_14 = arith.constant 0 : index
    %9 = vector.load %arg9[%c0_12, %c0_13, %c0_14] : memref<2x32x128xf32, #tpu.memory_space<vmem>>, vector<2x32x128xf32>
    tpu.vector_store %arg9[%c0_12, %c0_13, %c0_14], %8 {strides = array<i32>} : memref<2x32x128xf32, #tpu.memory_space<vmem>>, vector<2x32x128xf32>,
    %c1_i32 = arith.constant 1 : i32
    %10 = arith.cmpi eq, %arg0, %c1_i32 : i32
    %11 = arith.extui %10 : i1 to i32
    %c0_i32_15 = arith.constant 0 : i32
    %12 = arith.cmpi ne, %11, %c0_i32_15 : i32
    scf.if %12 {
      %c0_16 = arith.constant 0 : index
      %c0_17 = arith.constant 0 : index
      %c0_18 = arith.constant 0 : index
      %13 = vector.load %arg8[%c0_16, %c0_17, %c0_18] : memref<2x32x128xf32, #tpu.memory_space<vmem>>, vector<2x32x128xf32>
      %cst = arith.constant dense<0.000000e+00> : vector<2x32xf32>
      %14 = vector.multi_reduction <add>, %13, %cst [2] : vector<2x32x128xf32> to vector<2x32xf32>
      %cst_19 = arith.constant 3.906250e-03 : f32
      %15 = vector.broadcast %cst_19 : f32 to vector<2x32xf32>
      %16 = arith.mulf %14, %15 : vector<2x32xf32>
      %c0_20 = arith.constant 0 : index
      %c0_21 = arith.constant 0 : index
      %c0_22 = arith.constant 0 : index
      %17 = vector.load %arg9[%c0_20, %c0_21, %c0_22] : memref<2x32x128xf32, #tpu.memory_space<vmem>>, vector<2x32x128xf32>
      %cst_23 = arith.constant dense<0xFF800000> : vector<2x32xf32>
      %18 = vector.multi_reduction <maximumf>, %17, %cst_23 [2] : vector<2x32x128xf32> to vector<2x32xf32>
      %c0_24 = arith.constant 0 : index
      %c0_25 = arith.constant 0 : index
      %19 = vector.load %arg2[%c0_24, %c0_25] : memref<32x32xf32, #tpu.memory_space<vmem>>, vector<32x32xf32>
      %c0_26 = arith.constant 0 : index
      %c0_27 = arith.constant 0 : index
      %20 = vector.load %arg3[%c0_26, %c0_27] : memref<32x32xf32, #tpu.memory_space<vmem>>, vector<32x32xf32>
      %c0_28 = arith.constant 0 : index
      %c0_29 = arith.constant 0 : index
      %21 = vector.load %arg4[%c0_28, %c0_29] : memref<1x32xf32, #tpu.memory_space<vmem>>, vector<1x32xf32>
      %c0_30 = arith.constant 0 : index
      %c0_31 = arith.constant 0 : index
      %22 = vector.load %arg5[%c0_30, %c0_31] : memref<32x4xf32, #tpu.memory_space<vmem>>, vector<32x4xf32>
      %c0_32 = arith.constant 0 : index
      %c0_33 = arith.constant 0 : index
      %23 = vector.load %arg6[%c0_32, %c0_33] : memref<1x4xf32, #tpu.memory_space<vmem>>, vector<1x4xf32>
      %cst_34 = arith.constant dense<0.000000e+00> : vector<2x32xf32>
      %24 = tpu.matmul %18, %19, %cst_34 {dimension_numbers = #tpu.dot_dimension_numbers<[1], [0], [0], [1], [0, 0, 1, 1], [], []>} : vector<2x32xf32>, vector<32x32xf32>, vector<2x32xf32> -> vector<2x32xf32>
      %cst_35 = arith.constant dense<0.000000e+00> : vector<2x32xf32>
      %25 = tpu.matmul %16, %20, %cst_35 {dimension_numbers = #tpu.dot_dimension_numbers<[1], [0], [0], [1], [0, 0, 1, 1], [], []>} : vector<2x32xf32>, vector<32x32xf32>, vector<2x32xf32> -> vector<2x32xf32>
      %26 = arith.addf %24, %25 : vector<2x32xf32>
      %27 = vector.broadcast %21 : vector<1x32xf32> to vector<2x32xf32>
      %28 = arith.addf %26, %27 : vector<2x32xf32>
      %cst_36 = arith.constant 0.000000e+00 : f32
      %29 = vector.broadcast %cst_36 : f32 to vector<2x32xf32>
      %30 = arith.maximumf %28, %29 : vector<2x32xf32>
      %cst_37 = arith.constant dense<0.000000e+00> : vector<2x4xf32>
      %31 = tpu.matmul %30, %22, %cst_37 {dimension_numbers = #tpu.dot_dimension_numbers<[1], [0], [0], [1], [0, 0, 1, 1], [], []>} : vector<2x32xf32>, vector<32x4xf32>, vector<2x4xf32> -> vector<2x4xf32>
      %32 = vector.broadcast %23 : vector<1x4xf32> to vector<2x4xf32>
      %33 = arith.addf %31, %32 : vector<2x4xf32>
      %34 = math.tanh %33 : vector<2x4xf32>
      %cst_38 = arith.constant 0.000000e+00 : f32
      %35 = vector.broadcast %cst_38 : f32 to vector<2x4xf32>
      %36 = arith.maximumf %34, %35 : vector<2x4xf32>
      %c0_39 = arith.constant 0 : index
      %c0_40 = arith.constant 0 : index
      %37 = vector.load %arg7[%c0_39, %c0_40] : memref<2x4xf32, #tpu.memory_space<vmem>>, vector<2x4xf32>
      tpu.vector_store %arg7[%c0_39, %c0_40], %36 {strides = array<i32>} : memref<2x4xf32, #tpu.memory_space<vmem>>, vector<2x4xf32>,
    } else {
    }
    return
  }
  func.func @transform_0(%arg0: i32) -> (i32, i32, i32) {
    %c0_i32 = arith.constant 0 : i32
    %c0_i32_0 = arith.constant 0 : i32
    %c0_i32_1 = arith.constant 0 : i32
    return %c0_i32, %c0_i32_0, %arg0 : i32, i32, i32
  }
  func.func @transform_1(%arg0: i32) -> (i32, i32) {
    %c0_i32 = arith.constant 0 : i32
    %c0_i32_0 = arith.constant 0 : i32
    %c0_i32_1 = arith.constant 0 : i32
    return %c0_i32, %c0_i32_0 : i32, i32
  }
  func.func @transform_2(%arg0: i32) -> (i32, i32) {
    %c0_i32 = arith.constant 0 : i32
    %c0_i32_0 = arith.constant 0 : i32
    %c0_i32_1 = arith.constant 0 : i32
    return %c0_i32, %c0_i32_0 : i32, i32
  }
  func.func @transform_3(%arg0: i32) -> (i32, i32) {
    %c0_i32 = arith.constant 0 : i32
    %c0_i32_0 = arith.constant 0 : i32
    %c0_i32_1 = arith.constant 0 : i32
    return %c0_i32, %c0_i32_0 : i32, i32
  }
  func.func @transform_4(%arg0: i32) -> (i32, i32) {
    %c0_i32 = arith.constant 0 : i32
    %c0_i32_0 = arith.constant 0 : i32
    %c0_i32_1 = arith.constant 0 : i32
    return %c0_i32, %c0_i32_0 : i32, i32
  }
  func.func @transform_5(%arg0: i32) -> (i32, i32) {
    %c0_i32 = arith.constant 0 : i32
    %c0_i32_0 = arith.constant 0 : i32
    %c0_i32_1 = arith.constant 0 : i32
    return %c0_i32, %c0_i32_0 : i32, i32
  }
  func.func @transform_6(%arg0: i32) -> (i32, i32) {
    %c0_i32 = arith.constant 0 : i32
    %c0_i32_0 = arith.constant 0 : i32
    %c0_i32_1 = arith.constant 0 : i32
    return %c0_i32, %c0_i32_0 : i32, i32
  }
}

</mosaic_0001>

<bundles_post_ra>
// kernel: tpu_custom_call.1
= control target key start
LH: loop header
LB: loop body
LE: loop exit
PB: predicated region body
PF: predicated region fallthrough
CT: control target
= control target key end

     0   :  { %11 = vsyncpa [#allocation5], 0  ;;  %s1056_s0 = inlined_call_operand.hbm [shape: f32[2,32,256], index: 0, kind: input, shape index: {}]   ;;  %s1057_s1 = inlined_call_operand.vmem [shape: f32[32,32], index: 1, kind: input, shape index: {}]   ;;  %s1058_s2 = inlined_call_operand.hbm [shape: f32[32,32], index: 2, kind: input, shape index: {}]   ;;  %s1059_s3 = inlined_call_operand.vmem [shape: f32[1,32], index: 3, kind: input, shape index: {}]   ;;  %s1060_s4 = inlined_call_operand.vmem [shape: f32[32,4], index: 4, kind: input, shape index: {}]   ;;  %s1061_s5 = inlined_call_operand.vmem [shape: f32[1,4], index: 5, kind: input, shape index: {}]   ;;  %s1062_s6 = inlined_call_operand.hbm [shape: f32[2,4], index: 6, kind: output, shape index: {}]  }
   0x1   :  { %13 = vsyncpa [#allocation5 + $0x1], 0 }
   0x2   :  { %14 = vsyncpa [#allocation8], 0 }
   0x3   :  { %15 = vsyncpa [#allocation6], 0  ;;  %s888_s21 = smov 0   ;;  %s890_s22 = smov 0  }
   0x4   :  { %s892_s23 = smov 0   ;;  %s894_s24 = smov 0  }
   0x5 LB: > { %s907_s25 = sadd.s32 4294967295, %s844_s24   ;;  %p41_p0 = scmp.ne.s32.totalorder %s836_s22, %s832_s21  ;;  %s844_s24 = sphi %s894_s24, %s1069_s24   ;;  %s840_s23 = sphi %s892_s23, %s1068_s23   ;;  %s836_s22 = sphi %s890_s22, %s1067_s22   ;;  %s832_s21 = sphi %s888_s21, %s1066_s21  }
   0x6   : > { %p42_p1 = scmp.eq.s32.totalorder %s907_s25, 0  ;;  %p631_p2 = scmp.ge.s32.totalorder %s844_s24, 1 }
   0x7   : > { %p178_p3 = scmp.lt.s32.totalorder %s844_s24, 3  ;;  %p632_p4 = scmp.ne.s32.totalorder %s907_s25, 0 }
   0x8   : > { %p916_p5 = por %p42_p1, %p41_p0  ;;  %s192_s29 = sshll.u32 %s1058_s2, 4  ;;  %s193_s29 = int_to_ptr.hbm [resolvable:$true] %s192_s29 }
   0x9   : > { %p923_p6 = pnand %p631_p2, %p178_p3  ;;  %s846_s7 = smov [#allocation7]  }
   0xa   : > { %s194_s8 = sshll.u32 %s846_s7, 4  ;;  %s932_s9 = sadd.s32 1, %s844_s24   ;;  %s195_s8 = int_to_ptr.vmem [resolvable:$true] %s194_s8 }
   0xb   : > { %p658_p7 = pneg %p923_p6  ;;  %s847_s10 = smov 128  }
   0xc   : > { %s848_s11 = smov 8   ;;  %s25_s12 = ssub.s32 %s844_s24, %s932_s9 }
   0xd   : > { %p659_p8 = pnand %p658_p7, %p42_p1  ;;  %s28_s13 = sadd.s32 1, %s840_s23 }
   0xe   : > { %p26_p9 = scmp.eq.s32.totalorder %s25_s12, 0  ;;  %p35_p10 = scmp.ne.s32.totalorder %s840_s23, %s836_s22 }
   0xf   : > { %661 = dma.hbm_to_vmem [thread:$0]  (!%p659_p8), %s193_s29, 512, %s195_s8, [#allocation8], %s847_s10, %s847_s10, %s848_s11  }
  0x10   : > { %p36_p11 = scmp.eq.s32.totalorder %s844_s24, 0  ;;  %p667_p12 = scmp.lt.s32.totalorder %s844_s24, 2 }
  0x11   : > { %s945_s14 = scalar_select %p26_p9, %s840_s23, %s28_s13  }
  0x12   : > { %p37_p13 = por %p36_p11, %p35_p10  ;;  %s217_s15 = sand.u32 1, %s840_s23  }
  0x13   : > { %s634_s16 = sshll.u32 %s217_s15, 6  ;;  %s635_s17 = sshll.u32 %s844_s24, 3 }
  0x14   : > { %s225_s20 = scalar_lea.hbm %s1056_s0, %s635_s17  ;;  %s221_s21 = scalar_lea.vmem [#allocation4], %s634_s16 }
  0x15   : > { %s228_s27 = sshll.u32 %s221_s21, 4  ;;  %s226_s28 = sshll.u32 %s225_s20, 4  ;;  %s229_s27 = int_to_ptr.vmem [resolvable:$true] %s228_s27  ;;  %s227_s28 = int_to_ptr.hbm [resolvable:$true] %s226_s28 }
  0x16   : > { %p952_p0 = pnand %p667_p12, %p37_p13  ;;  %s218_s7 = scalar_lea.sflag [#allocation5], %s217_s15 }
  0x17   : > { %s744_s8 = sshra.s32 %s227_s28, 4  ;;  %s751_s16 = scalar_lea.hbm %s1056_s0, 128  ;;  %s745_s8 = int_to_ptr.hbm [resolvable:$true] %s744_s8 }
  0x18   : > { %s746_s12 = scalar_lea.hbm %s745_s8, 64  ;;  %p748_p3 = pneg %p952_p0 }
  0x19   : > { %p747_p2 = scmp.ne.s32.totalorder %s745_s8, %s746_s12  ;;  %p752_p9 = scmp.lt.s32.totalorder %s745_s8, %s1056_s0 }
  0x1a   : > { %p753_p10 = scmp.lt.s32.totalorder %s751_s16, %s746_s12 }
  0x1b   : > { %p749_p7 = pnand %p748_p3, %p747_p2 }
  0x1c   : > { %p754_p11 = por %p753_p10, %p752_p9 }
  0x1d   : > { %p750_p8 = pneg %p749_p7 }
  0x1f   : > { %p755_p12 = pnand %p754_p11, %p750_p8 }
  0x21   : > { %758 = shalt.err (!%p755_p12)
}
  0x22   : > { %s849_s15 = smov 256   ;;  %240 = sbr.rel (%p923_p6) target bundleno = 525 (0x20d), region = 44 }
  0x23   : > { %665 = dma.hbm_to_vmem [thread:$0]  (!%p952_p0), %s227_s28, 1024, %s229_s27, %s218_s7, %s849_s15, %s847_s10, %s848_s11  }
  0x24   : > { %s242_s19 = sand.u32 (!%p923_p6), 1, %s836_s22  }
  0x25   : > { %s637_s20 = sshll.u32 (!%p923_p6), %s242_s19, 6  ;;  %s243_s21 = scalar_lea.sflag (!%p923_p6), [#allocation5], %s242_s19 }
  0x26   : > { %s971_s24 = scalar_lea.vmem (!%p923_p6), [#allocation4], %s637_s20 }
  0x27   : > { %819 = dma.done.wait (%p916_p5), %s243_s21, 1024  }
  0x28   : > { %821 = vsyncadd (%p916_p5), %s243_s21, 4294966272 }
  0x29   : > { %823 = dma.done.wait (%p42_p1), [#allocation8], 512  }
  0x2a   : > { %825 = vsyncadd (%p42_p1), [#allocation8], 4294966784  ;;  %279 = sbr.rel (%p632_p4) target bundleno = 64 (0x40), region = 56 }
  0x2f   : > { %v850_v0 = vmov 0.0   ;;  %v851_v1 = vmov -inf  }
  0x30   : > { %280 = vst [vmem:[#allocation2 + $0x30] sm:$0xff] %v850_v0 }
  0x31   : > { %281 = vst [vmem:[#allocation2] sm:$0xff] %v850_v0 }
  0x32   : > { %282 = vst [vmem:[#allocation2 + $0x18] sm:$0xff] %v850_v0 }
  0x33   : > { %283 = vst [vmem:[#allocation2 + $0x10] sm:$0xff] %v850_v0 }
  0x34   : > { %284 = vst [vmem:[#allocation2 + $0x8] sm:$0xff] %v850_v0 }
  0x35   : > { %285 = vst [vmem:[#allocation2 + $0x20] sm:$0xff] %v850_v0 }
  0x36   : > { %286 = vst [vmem:[#allocation2 + $0x28] sm:$0xff] %v850_v0 }
  0x37   : > { %287 = vst [vmem:[#allocation2 + $0x38] sm:$0xff] %v850_v0 }
  0x38   : > { %288 = vst [vmem:[#allocation3] sm:$0xff] %v851_v1 }
  0x39   : > { %289 = vst [vmem:[#allocation3 + $0x18] sm:$0xff] %v851_v1 }
  0x3a   : > { %290 = vst [vmem:[#allocation3 + $0x10] sm:$0xff] %v851_v1 }
  0x3b   : > { %291 = vst [vmem:[#allocation3 + $0x20] sm:$0xff] %v851_v1 }
  0x3c   : > { %292 = vst [vmem:[#allocation3 + $0x28] sm:$0xff] %v851_v1 }
  0x3d   : > { %293 = vst [vmem:[#allocation3 + $0x8] sm:$0xff] %v851_v1 }
  0x3e   : > { %294 = vst [vmem:[#allocation3 + $0x30] sm:$0xff] %v851_v1 }
  0x3f   : > { %295 = vst [vmem:[#allocation3 + $0x38] sm:$0xff] %v851_v1 }
  0x40 PF: > { %v296_v2 = vld [vmem:[%s971_s24] sm:$0xff]  ;;  %v304_v3 = vld [vmem:[#allocation2 + $0x30] sm:$0xff]  ;;  %v297_v4 = vld [vmem:[%s971_s24 + $0x8] sm:$0xff]  ;;  %p640_p1 = scmp.ne.s32.totalorder %s907_s25, 1 }
  0x41   : > { %v312_v5 = vadd.f32 %v304_v3, %v296_v2  ;;  %v305_v6 = vld [vmem:[#allocation2] sm:$0xff]  ;;  %v298_v7 = vld [vmem:[%s971_s24 + $0x10] sm:$0xff]  ;;  %v306_v8 = vld [vmem:[#allocation2 + $0x18] sm:$0xff] }
  0x42   : > { %v313_v9 = vadd.f32 %v305_v6, %v297_v4  ;;  %v314_v10 = vadd.f32 %v306_v8, %v298_v7  ;;  %v299_v11 = vld [vmem:[%s971_s24 + $0x18] sm:$0xff]  ;;  %v307_v12 = vld [vmem:[#allocation2 + $0x10] sm:$0xff]  ;;  %v300_v13 = vld [vmem:[%s971_s24 + $0x20] sm:$0xff] }
  0x43   : > { %320 = vst [vmem:[#allocation2 + $0x30] sm:$0xff] %v312_v5  ;;  %v315_v14 = vadd.f32 %v307_v12, %v299_v11  ;;  %v308_v15 = vld [vmem:[#allocation2 + $0x8] sm:$0xff]  ;;  %v309_v17 = vld [vmem:[#allocation2 + $0x20] sm:$0xff]  ;;  %v302_v20 = vld [vmem:[%s971_s24 + $0x30] sm:$0xff] }
  0x44   : > { %v301_v16 = vld [vmem:[%s971_s24 + $0x28] sm:$0xff]  ;;  %321 = vst [vmem:[#allocation2] sm:$0xff] %v313_v9  ;;  %v316_v18 = vadd.f32 %v308_v15, %v300_v13  ;;  %v303_v22 = vld [vmem:[%s971_s24 + $0x38] sm:$0xff]  ;;  %v328_v25 = vld [vmem:[#allocation3] sm:$0xff] }
  0x45   : > { %v317_v19 = vadd.f32 %v309_v17, %v301_v16  ;;  %v310_v21 = vld [vmem:[#allocation2 + $0x28] sm:$0xff]  ;;  %322 = vst [vmem:[#allocation2 + $0x18] sm:$0xff] %v314_v10  ;;  %v311_v24 = vld [vmem:[#allocation2 + $0x38] sm:$0xff]  ;;  %v330_v28 = vld [vmem:[#allocation3 + $0x10] sm:$0xff]  ;;  %v336_v29 = vmax.f32 %v328_v25, %v296_v2 }
  0x46   : > { %v318_v23 = vadd.f32 %v310_v21, %v302_v20  ;;  %v329_v26 = vld [vmem:[#allocation3 + $0x18] sm:$0xff]  ;;  %323 = vst [vmem:[#allocation2 + $0x10] sm:$0xff] %v315_v14  ;;  %v319_v27 = vadd.f32 %v311_v24, %v303_v22  ;;  %v331_v30 = vld [vmem:[#allocation3 + $0x20] sm:$0xff]  ;;  %v332_v32 = vld [vmem:[#allocation3 + $0x28] sm:$0xff]  ;;  %v338_v33 = vmax.f32 %v330_v28, %v298_v7 }
  0x47   : > { %324 = vst [vmem:[#allocation2 + $0x8] sm:$0xff] %v316_v18  ;;  %v337_v31 = vmax.f32 %v329_v26, %v297_v4  ;;  %v333_v34 = vld [vmem:[#allocation3 + $0x8] sm:$0xff]  ;;  %v339_v35 = vmax.f32 %v331_v30, %v299_v11  ;;  %v334_v36 = vld [vmem:[#allocation3 + $0x30] sm:$0xff]  ;;  %v340_v37 = vmax.f32 %v332_v32, %v300_v13  ;;  %v335_v38 = vld [vmem:[#allocation3 + $0x38] sm:$0xff] }
  0x48   : > { %325 = vst [vmem:[#allocation2 + $0x20] sm:$0xff] %v317_v19  ;;  %v341_v39 = vmax.f32 %v333_v34, %v301_v16  ;;  %v342_v40 = vmax.f32 %v334_v36, %v302_v20  ;;  %v343_v41 = vmax.f32 %v335_v38, %v303_v22 }
  0x49   : > { %326 = vst [vmem:[#allocation2 + $0x28] sm:$0xff] %v318_v23 }
  0x4a   : > { %327 = vst [vmem:[#allocation2 + $0x38] sm:$0xff] %v319_v27 }
  0x4b   : > { %344 = vst [vmem:[#allocation3] sm:$0xff] %v336_v29 }
  0x4c   : > { %345 = vst [vmem:[#allocation3 + $0x18] sm:$0xff] %v337_v31 }
  0x4d   : > { %346 = vst [vmem:[#allocation3 + $0x10] sm:$0xff] %v338_v33 }
  0x4e   : > { %347 = vst [vmem:[#allocation3 + $0x20] sm:$0xff] %v339_v35  ;;  %355 = sbr.rel (%p640_p1) target bundleno = 520 (0x208), region = 60 }
  0x4f   : > { %348 = vst [vmem:[#allocation3 + $0x28] sm:$0xff] %v340_v37 }
  0x50   : > { %349 = vst [vmem:[#allocation3 + $0x8] sm:$0xff] %v341_v39 }
  0x51   : > { %350 = vst [vmem:[#allocation3 + $0x30] sm:$0xff] %v342_v40 }
  0x52   : > { %351 = vst [vmem:[#allocation3 + $0x38] sm:$0xff] %v343_v41 }
  0x53   : > { %v360_v42 = vld [vmem:[#allocation2 + $0x8] sm:$0xff]  ;;  %v356_v43 = vld [vmem:[#allocation2 + $0x30] sm:$0xff]  ;;  %v358_v44 = vld [vmem:[#allocation2 + $0x18] sm:$0xff]  ;;  %v434_v1 = vlaneseq  ;;  %vm439_vm0 = vcmask 130112   ;;  %vm443_vm1 = vcmask 195712   ;;  %vm447_vm2 = vcmask 261312  }
  0x54   : > { %372 = vadd.xlane.f32.xlu1 %v360_v42  ;;  %364 = vadd.xlane.f32.xlu0 %v356_v43  ;;  %v361_v45 = vld [vmem:[#allocation2 + $0x20] sm:$0xff]  ;;  %v362_v47 = vld [vmem:[#allocation2 + $0x28] sm:$0xff]  ;;  %v363_v48 = vld [vmem:[#allocation2 + $0x38] sm:$0xff]  ;;  %vm456_vm3 = vcmask 1041409   ;;  %vm458_vm4 = vcmask 261120   ;;  %vm559_vm5 = vcmask 25600  }
  0x55   : > { %368 = vadd.xlane.f32.xlu2 %v358_v44  ;;  %v357_v46 = vld [vmem:[#allocation2] sm:$0xff]  ;;  %v359_v49 = vld [vmem:[#allocation2 + $0x10] sm:$0xff]  ;;  %v389_v52 = vld [vmem:[#allocation3 + $0x18] sm:$0xff]  ;;  %v435_v4 = vand.u32 127, %v434_v1 }
  0x56   : > { %v388_v50 = vld [vmem:[#allocation3] sm:$0xff]  ;;  %v392_v51 = vld [vmem:[#allocation3 + $0x28] sm:$0xff]  ;;  %v390_v55 = vld [vmem:[#allocation3 + $0x10] sm:$0xff] }
  0x57   : > { %v393_v53 = vld [vmem:[#allocation3 + $0x8] sm:$0xff]  ;;  %v391_v56 = vld [vmem:[#allocation3 + $0x20] sm:$0xff]  ;;  %v419_v58 = vld [vmem:[#allocation7 + $0x18] sm:$0xff]  ;;  %v437_v8 = vadd.s32 4294967288, %v435_v4  ;;  %v441_v15 = vadd.s32 4294967280, %v435_v4  ;;  %v445_v22 = vadd.s32 4294967272, %v435_v4 }
  0x58   : > { %v394_v54 = vld [vmem:[#allocation3 + $0x30] sm:$0xff]  ;;  %473 = vmatpush.msra.mxu0 %v419_v58  ;;  %v417_v60 = vld [vmem:[#allocation7 + $0x8] sm:$0xff]  ;;  %v416_v61 = vld [vmem:[#allocation7] sm:$0xff] }
  0x59   : > { %v395_v57 = vld [vmem:[#allocation3 + $0x38] sm:$0xff]  ;;  %v418_v59 = vld [vmem:[#allocation7 + $0x10] sm:$0xff]  ;;  %v413_v12 = vld [vmem:[%s1057_s1 + $0x8] sm:$0xff] }
  0x5a   : > { %474 = vmatpush.msra.mxu0 %v418_v59  ;;  %v415_v2 = vld [vmem:[%s1057_s1 + $0x18] sm:$0xff]  ;;  %v414_v3 = vld [vmem:[%s1057_s1 + $0x10] sm:$0xff]  ;;  %v412_v13 = vld [vmem:[%s1057_s1] sm:$0xff] }
  0x5b   : > { %518 = vmatpush.msra.mxu1 %v415_v2  ;;  %v710_v1 = vld [vmem:[%s1059_s3] ss:$0 sm:$0xff] }
  0x5c   : > { %374 = vadd.xlane.f32.xlu1 %v361_v45  ;;  %366 = vadd.xlane.f32.xlu0 %v357_v46 }
  0x5d   : > { %376 = vadd.xlane.f32.xlu2 %v362_v47  ;;  %475 = vmatpush.msra.mxu0 %v417_v60 }
  0x5e   : > { %519 = vmatpush.msra.mxu1 %v414_v3 }
  0x5f   : > { %476 = vmatpush.msra.mxu0 %v416_v61  ;;  %v424_v61 = vld [vmem:[%s1060_s4 + $0x18] sm:$0xff] }
  0x60   : > { %520 = vmatpush.msra.mxu1 %v413_v12  ;;  %549 = vmatpush.msra.mxu2 %v424_v61 }
  0x62   : > { %521 = vmatpush.msra.mxu1 %v412_v13 }
  0x64   : > { %378 = vadd.xlane.f32.xlu1 %v363_v48  ;;  %370 = vadd.xlane.f32.xlu0 %v359_v49 }
  0x65   : > { %396 = vmax.xlane.f32.xlu2 %v388_v50 }
  0x6c   : > { %404 = vmax.xlane.f32.xlu1 %v392_v51  ;;  %398 = vmax.xlane.f32.xlu0 %v389_v52 }
  0x6d   : > { %406 = vmax.xlane.f32.xlu2 %v393_v53 }
  0x74   : > { %408 = vmax.xlane.f32.xlu1 %v394_v54  ;;  %400 = vmax.xlane.f32.xlu0 %v390_v55 }
  0x75   : > { %402 = vmax.xlane.f32.xlu2 %v391_v56 }
  0x7c   : > { %410 = vmax.xlane.f32.xlu0 %v395_v57 }
  0xc7   : > { %v373_v62 = vpop.xlane.xlu1 %372  ;;  %v365_v63 = vpop.xlane.xlu0 %364 }
  0xc8   : > { %v369_v0 = vpop.xlane.xlu2 %368  ;;  %v384_v7 = vmul.f32 0.00390625, %v373_v62  ;;  %v380_v14 = vmul.f32 0.00390625, %v365_v63  ;;  %v423_v62 = vld [vmem:[%s1060_s4 + $0x10] sm:$0xff]  ;;  %v422_v63 = vld [vmem:[%s1060_s4 + $0x8] sm:$0xff] }
  0xc9   : > { %v382_v16 = vmul.f32 0.00390625, %v369_v0  ;;  %550 = vmatpush.msra.mxu2 %v423_v62  ;;  %v421_v0 = vld [vmem:[%s1060_s4] sm:$0xff] }
  0xca   : > { %v449_v18 = vperm.slane %v384_v7, %v435_v4  ;;  %v436_v21 = vperm.slane %v380_v14, %v435_v4  ;;  %v711_v7 = vld [vmem:[%s1061_s5] ss:$0 sm:$0xff] }
  0xcb   : > { %v442_v23 = vperm.slane %v382_v16, %v441_v15  ;;  %551 = vmatpush.msra.mxu2 %v422_v63 }
  0xcd   : > { %552 = vmatpush.msra.mxu2 %v421_v0 }
  0xcf   : > { %v375_v5 = vpop.xlane.xlu1 %374  ;;  %v367_v6 = vpop.xlane.xlu0 %366 }
  0xd0   : > { %v385_v9 = vmul.f32 0.00390625, %v375_v5  ;;  %v381_v10 = vmul.f32 0.00390625, %v367_v6  ;;  %v377_v11 = vpop.xlane.xlu2 %376 }
  0xd1   : > { %v386_v17 = vmul.f32 0.00390625, %v377_v11 }
  0xd2   : > { %v450_v19 = vperm.slane %v385_v9, %v437_v8  ;;  %v438_v20 = vperm.slane %v381_v10, %v437_v8 }
  0xd3   : > { %v452_v24 = vperm.slane %v386_v17, %v441_v15 }
  0xd4   : > { %v451_v27 = vsel %vm439_vm0, %v450_v19, %v449_v18  ;;  %v440_v28 = vsel %vm439_vm0, %v438_v20, %v436_v21 }
  0xd5   : > { %v444_v34 = vsel %vm443_vm1, %v442_v23, %v440_v28  ;;  %v453_v35 = vsel %vm443_vm1, %v452_v24, %v451_v27 }
  0xd7   : > { %v379_v25 = vpop.xlane.xlu1 %378  ;;  %v371_v26 = vpop.xlane.xlu0 %370 }
  0xd8   : > { %v387_v29 = vmul.f32 0.00390625, %v379_v25  ;;  %v383_v30 = vmul.f32 0.00390625, %v371_v26  ;;  %v397_v31 = vpop.xlane.xlu2 %396 }
  0xd9   : > { %v489_v43 = vperm.slane %v397_v31, %v435_v4 }
  0xda   : > { %v454_v32 = vperm.slane %v387_v29, %v445_v22  ;;  %v446_v33 = vperm.slane %v383_v30, %v445_v22 }
  0xdc   : > { %v448_v36 = vsel %vm447_vm2, %v446_v33, %v444_v34  ;;  %v455_v37 = vsel %vm447_vm2, %v454_v32, %v453_v35 }
  0xdd   : > { %v457_v38 = vsel %vm456_vm3, %v455_v37, %v448_v36 }
  0xde   : > { %641 = vmatmul.msk.f32.vlgmr.msra.gmra.mxu0 %vm458_vm4, %v457_v38 }
  0xdf   : > { %v399_v39 = vpop.xlane.xlu0 %398  ;;  %v405_v40 = vpop.xlane.xlu1 %404 }
  0xe0   : > { %v407_v41 = vpop.xlane.xlu2 %406  ;;  %v496_v44 = vperm.slane %v405_v40, %v435_v4  ;;  %v490_v45 = vperm.slane %v399_v39, %v437_v8 }
  0xe1   : > { %v497_v46 = vperm.slane %v407_v41, %v437_v8 }
  0xe2   : > { %v491_v51 = vsel %vm439_vm0, %v490_v45, %v489_v43 }
  0xe3   : > { %v498_v52 = vsel %vm439_vm0, %v497_v46, %v496_v44 }
  0xe7   : > { %v401_v42 = vpop.xlane.xlu0 %400  ;;  %v409_v47 = vpop.xlane.xlu1 %408 }
  0xe8   : > { %v492_v48 = vperm.slane %v401_v42, %v441_v15  ;;  %v403_v49 = vpop.xlane.xlu2 %402  ;;  %v499_v50 = vperm.slane %v409_v47, %v441_v15 }
  0xe9   : > { %v494_v53 = vperm.slane %v403_v49, %v445_v22 }
  0xea   : > { %v493_v54 = vsel %vm443_vm1, %v492_v48, %v491_v51  ;;  %v500_v57 = vsel %vm443_vm1, %v499_v50, %v498_v52 }
  0xeb   : > { %v495_v58 = vsel %vm447_vm2, %v494_v53, %v493_v54 }
  0xef   : > { %v411_v55 = vpop.xlane.xlu0 %410 }
  0xf0   : > { %v501_v56 = vperm.slane %v411_v55, %v445_v22 }
  0xf2   : > { %v502_v59 = vsel %vm447_vm2, %v501_v56, %v500_v57 }
  0xf3   : > { %v503_v60 = vsel %vm456_vm3, %v502_v59, %v495_v58 }
  0xf4   : > { %642 = vmatmul.msk.f32.vlgmr.msra.gmra.mxu1 %vm458_vm4, %v503_v60 }
 0x15b   : > { %v478_v2 = vpop.f32.mrf.mxu0 }
 0x171   : > { %v523_v3 = vpop.f32.mrf.mxu1 }
 0x172   : > { %v524_v4 = vadd.f32 %v523_v3, %v478_v2 }
 0x174   : > { %v529_v5 = vadd.f32 %v710_v1, %v524_v4 }
 0x176   : > { %v530_v6 = vmax.f32 %v529_v5, 0.0 }
 0x178   : > { %643 = vmatmul.msk.f32.vlgmr.msra.gmra.mxu2 %vm458_vm4, %v530_v6 }
 0x1fb   : > { %v554_v8 = vpop.f32.mrf.mxu2 }
 0x1fc   : > { %v555_v9 = vadd.f32 %v711_v7, %v554_v8 }
 0x1fe   : > { %712 = vtanh.f32 %v555_v9 }
 0x204   : > { %v713_v10 = vpop.eup %712 }
 0x205   : > { %v558_v11 = vmax.f32 %v713_v10, 0.0 }
 0x207   : > { %560 = vst.msk [vmem:[#allocation9] sm:$0x3] %vm559_vm5, %v558_v11 }
 0x208 PF: > { %p669_p4 = scmp.eq.s32.totalorder %s907_s25, 1  ;;  %s852_s30 = smov [#allocation9]  }
 0x209   : > { %s567_s10 = sshll.u32 %s852_s30, 4  ;;  %s569_s28 = sshll.u32 %s1062_s6, 4  ;;  %s568_s10 = int_to_ptr.vmem [resolvable:$true] %s567_s10  ;;  %s570_s28 = int_to_ptr.hbm [resolvable:$true] %s569_s28 }
 0x20a   : > { %655 = dma.vmem_to_hbm [thread:$0]  (%p669_p4), %s568_s10, 32, %s570_s28, [#allocation6]  }
 0x20b   : > { %827 = dma.done.wait (%p669_p4), [#allocation6], 32  }
 0x20c   : > { %829 = vsyncadd (%p669_p4), [#allocation6], 4294967264 }
 0x20d PF: > { %p18_p5 = scmp.ge.s32.totalorder %s932_s9, 4   ;;  %s1066_s21 = smov %s836_s22 }
 0x20e   : > { %s1067_s22 = smov %s840_s23  ;;  %s1068_s23 = smov %s945_s14 }
 0x20f   : > { %s1069_s24 = smov %s932_s9  ;;  %20 = sbr.rel (!%p18_p5) target bundleno = 5 (0x5), region = 93 }
 0x214   :  { %583 = vsyncpa [#allocation5], 1 }
 0x215   :  { %585 = vsyncpa [#allocation5 + $0x1], 1 }
 0x216   :  { %586 = vsyncpa [#allocation8], 1 }
 0x217   :  { %587 = vsyncpa [#allocation6], 1 }
 0x218   :  { %589 = vsyncpa [#allocation6 + $0x1], 1 }

</bundles_post_ra>
